<compile_context>
chip_gen: v5e
topology: v5e:2x2
jax: 0.10.0
libtpu: 0.0.40
codegen_flags: <defaults>
</compile_context>

<pallas_src>
import jax
import jax.numpy as jnp
from jax.experimental import pallas as pl
from jax.experimental.pallas import tpu as pltpu

MLP_SCALE = 4
LN_EPS = 1e-5


def _gelu_tanh(x):
    # Matches torch.nn.GELU(approximate='tanh'); keep in f32.
    c = jnp.sqrt(2.0 / jnp.pi).astype(x.dtype)
    return 0.5 * x * (1.0 + jnp.tanh(c * (x + 0.044715 * x * x * x)))


def _round_up(n, m):
    return ((n + m - 1) // m) * m


def _vmem_capacity_bytes():
    try:
        return int(pltpu.get_tpu_info().vmem_capacity_bytes)
    except Exception:
        return 64 << 20  # conservative fallback: v7x per-TC VMEM


def _no_attn_execute_kernel(x_ref, w1_ref, b1_ref, w2_ref, o_ref, xn_ref, acc_ref):
    """Grid = (token_tiles, H_tiles); H is the inner (reduction) axis.

    x_ref  : (tn, C)  input tokens (constant block index across H -> fetched once)
    w1_ref : (C, th)  LN-gamma-folded c_fc weight chunk (bf16)
    b1_ref : (1, th)  LN-beta-folded  c_fc bias chunk   (f32)
    w2_ref : (th, C)  c_proj weight chunk               (bf16)
    o_ref  : (tn, C)  output
    xn_ref : (tn, C)  scratch: normalized x in matmul dtype
    acc_ref: (tn, C)  scratch: f32 accumulator for c_proj
    """
    h_idx = pl.program_id(1)

    @pl.when(h_idx == 0)
    def _():
        # LayerNorm without affine (gamma/beta folded into w1/b1).  f32 math.
        x = x_ref[...].astype(jnp.float32)
        mean = jnp.mean(x, axis=-1, keepdims=True)
        xc = x - mean
        var = jnp.mean(xc * xc, axis=-1, keepdims=True)
        xn = xc * jax.lax.rsqrt(var + LN_EPS)
        # NOTE: padded tail token rows are all-zero -> var == 0 -> rsqrt(eps).
        # That is finite (no NaN) and those rows are sliced off by the wrapper.
        xn_ref[...] = xn.astype(xn_ref.dtype)      # bf16 operand for the MXU
        acc_ref[...] = jnp.zeros_like(acc_ref)

    # c_fc chunk: bf16 x bf16 -> f32 accumulate, then bias + tanh-GELU in f32.
    h = jnp.dot(xn_ref[...], w1_ref[...], preferred_element_type=jnp.float32)
    h = _gelu_tanh(h + b1_ref[...])
    # c_proj chunk: accumulate the H-reduction in f32.
    acc_ref[...] += jnp.dot(h.astype(w2_ref.dtype), w2_ref[...],
                            preferred_element_type=jnp.float32)

    @pl.when(h_idx == pl.num_programs(1) - 1)
    def _():
        o_ref[...] = acc_ref[...].astype(o_ref.dtype)


def prepare_params(ln_w, ln_b, fc_w, fc_b, proj_w, *, h_tile=1024,
                   matmul_dtype=jnp.bfloat16):
    """One-time weight prep: fold LN affine into c_fc, transpose, pad H, cast.

    Exact algebra:  (xn*g + b) @ W1^T + b1  ==  xn @ (g[:,None]*W1^T) + (b @ W1^T + b1)

    ln_w, ln_b : (C,)     fc_w : (H, C)   fc_b : (H,)   proj_w : (C, H)
    """
    H, C = fc_w.shape
    assert proj_w.shape == (C, H) and fc_b.shape == (H,)
    assert ln_w.shape == (C,) and ln_b.shape == (C,)

    f32 = jnp.float32
    fc_wT = fc_w.astype(f32).T                              # (C, H)
    w1 = ln_w.astype(f32)[:, None] * fc_wT                  # LN gamma folded in
    b1 = ln_b.astype(f32) @ fc_wT + fc_b.astype(f32)        # LN beta folded in
    w2 = proj_w.astype(f32).T                               # (H, C)

    th = min(_round_up(h_tile, 128), _round_up(H, 128))
    H_pad = _round_up(H, th)
    if H_pad != H:
        # Zero-padding is exact: gelu(0 + 0) = 0 and the padded w2 rows are 0.
        w1 = jnp.pad(w1, ((0, 0), (0, H_pad - H)))
        b1 = jnp.pad(b1, (0, H_pad - H))
        w2 = jnp.pad(w2, ((0, H_pad - H), (0, 0)))

    return dict(
        w1=w1.astype(matmul_dtype),          # (C, H_pad)
        b1=b1.reshape(1, H_pad).astype(f32),  # (1, H_pad)
        w2=w2.astype(matmul_dtype),          # (H_pad, C)
        C=C, H_pad=H_pad, th=th,
    )


def no_attn_execute_prepared(x, params, attn=None, *, token_tile=512):
    """Fused LN -> c_fc -> GELU(tanh) -> c_proj with prepared params.

    x : (B, T, C).  `attn` is unused (the PyTorch module ignores it too).
    """
    del attn
    w1, b1, w2 = params["w1"], params["b1"], params["w2"]
    C, H_pad, th = params["C"], params["H_pad"], params["th"]
    B, T, Cx = x.shape
    assert Cx == C

    N = B * T
    wbytes = jnp.dtype(w1.dtype).itemsize

    # Generation-aware VMEM budget (v5e/v6e: 128 MiB, v7x: 64 MiB per TC).
    cap = _vmem_capacity_bytes()
    budget = max(cap - (8 << 20), 24 << 20)

    def est(tn_):
        act = 2 * tn_ * C * 4 * 2                              # x + out, double buffered
        wts = 2 * (C * th * wbytes + th * 4 + th * C * wbytes)  # weight/bias chunks
        scr = tn_ * C * (wbytes + 4)                           # xn + acc scratch
        mid = tn_ * th * 4                                     # (tn, th) f32 intermediate
        return act + wts + scr + mid + (4 << 20)               # headroom

    # Large, 128-aligned token tile; shrink until the VMEM estimate fits.
    tn = min(_round_up(token_tile, 128), _round_up(N, 8))
    while est(tn) > budget and tn > 128:
        tn = max(128, tn // 2)
    tn = min(tn, _round_up(N, 8))
    n_pad = _round_up(N, tn)

    x2 = x.reshape(N, C)
    if n_pad != N:
        x2 = jnp.pad(x2, ((0, n_pad - N), (0, 0)))

    vmem_limit = int(min(max(est(tn), 32 << 20), budget))
    grid = (n_pad // tn, H_pad // th)

    out = pl.pallas_call(
        _no_attn_execute_kernel,
        out_shape=jax.ShapeDtypeStruct((n_pad, C), x.dtype),
        grid_spec=pltpu.PrefetchScalarGridSpec(
            num_scalar_prefetch=0,
            grid=grid,
            in_specs=[
                pl.BlockSpec((tn, C), lambda i, h: (i, 0)),   # x (re-used across H)
                pl.BlockSpec((C, th), lambda i, h: (0, h)),   # folded c_fc weight chunk
                pl.BlockSpec((1, th), lambda i, h: (0, h)),   # folded c_fc bias chunk
                pl.BlockSpec((th, C), lambda i, h: (h, 0)),   # c_proj weight chunk
            ],
            out_specs=pl.BlockSpec((tn, C), lambda i, h: (i, 0)),
            scratch_shapes=[
                pltpu.VMEM((tn, C), w1.dtype),     # normalized x (matmul dtype)
                pltpu.VMEM((tn, C), jnp.float32),  # c_proj accumulator
            ],
        ),
        compiler_params=pltpu.CompilerParams(
            # TODO(synk): on v7x, CORE_PARALLEL on the token axis would shard the
            # 2 TensorCores explicitly; "parallel" is kept for portability.
            dimension_semantics=("parallel", "arbitrary"),
            vmem_limit_bytes=vmem_limit,
        ),
    )(x2, w1, b1, w2)

    return out[:N].reshape(B, T, C)


def no_attn_execute(x, ln_w, ln_b, fc_w, fc_b, proj_w, attn=None, *,
                    token_tile=512, h_tile=1024, matmul_dtype=jnp.bfloat16):
    """Convenience wrapper taking raw PyTorch-layout parameters."""
    params = prepare_params(ln_w, ln_b, fc_w, fc_b, proj_w,
                            h_tile=h_tile, matmul_dtype=matmul_dtype)
    return no_attn_execute_prepared(x, params, attn, token_tile=token_tile)


def _reference(x, ln_w, ln_b, fc_w, fc_b, proj_w):
    """Pure-JAX (f32) mirror of the PyTorch forward."""
    mean = jnp.mean(x, axis=-1, keepdims=True)
    var = jnp.mean((x - mean) ** 2, axis=-1, keepdims=True)
    xn = (x - mean) / jnp.sqrt(var + LN_EPS)
    xn = xn * ln_w + ln_b
    h = _gelu_tanh(xn @ fc_w.T + fc_b)
    return h @ proj_w.T


if __name__ == "__main__":
    # Small config consistent with the module: n_embd = 128 (lane-aligned),
    # hidden = MLP_SCALE * n_embd = 512, B=2, T=8.
    Bsz, Tseq, C = 2, 8, 128
    H = MLP_SCALE * C

    key = jax.random.PRNGKey(0)
    kx, ka, kg, kb, k1, k2, k3 = jax.random.split(key, 7)

    x = jax.random.normal(kx, (Bsz, Tseq, C), dtype=jnp.float32)
    attn = jax.random.normal(ka, (Bsz, Tseq, C), dtype=jnp.float32)  # unused by forward

    ln_w = 1.0 + 0.1 * jax.random.normal(kg, (C,), dtype=jnp.float32)
    ln_b = 0.1 * jax.random.normal(kb, (C,), dtype=jnp.float32)

    fc_w = 0.02 * jax.random.normal(k1, (H, C), dtype=jnp.float32)    # c_fc.weight
    fc_b = 0.02 * jax.random.normal(k2, (H,), dtype=jnp.float32)      # c_fc.bias
    proj_w = 0.02 * jax.random.normal(k3, (C, H), dtype=jnp.float32)  # c_proj.weight

    # Prepare weights once (fold LN affine, transpose, cast to bf16, pad H).
    params = prepare_params(ln_w, ln_b, fc_w, fc_b, proj_w)
    out = no_attn_execute_prepared(x, params, attn)
    out = jax.block_until_ready(out)

    ref = _reference(x, ln_w, ln_b, fc_w, fc_b, proj_w)
    assert out.shape == (Bsz, Tseq, C)
    assert jnp.all(jnp.isfinite(out)), "non-finite output"
    # bf16 MXU operands -> loosened tolerance vs. the pure-f32 reference.
    assert jnp.allclose(out, ref, atol=2e-2, rtol=2e-2), "mismatch vs JAX reference"

    print("KERNEL_OK")
</pallas_src>

<mosaic_0001>
module attributes {stable_mosaic.version = 11 : i64} {
  func.func @_no_attn_execute_kernel(%arg0: i32, %arg1: i32, %arg2: memref<16x128xf32, #tpu.memory_space<vmem>>, %arg3: memref<128x512xbf16, #tpu.memory_space<vmem>>, %arg4: memref<1x512xf32, #tpu.memory_space<vmem>>, %arg5: memref<512x128xbf16, #tpu.memory_space<vmem>>, %arg6: memref<16x128xf32, #tpu.memory_space<vmem>>, %arg7: memref<16x128xbf16, #tpu.memory_space<vmem>>, %arg8: memref<16x128xf32, #tpu.memory_space<vmem>>) attributes {dimension_semantics = [#tpu.dimension_semantics<parallel>, #tpu.dimension_semantics<arbitrary>], iteration_bounds = array<i64: 1, 1>, scalar_prefetch = 0 : i64, scratch_operands = 2 : i64, tpu.core_type = #tpu.core_type<tc>, window_params = [{transform_indices = @transform_0, window_bounds = array<i64: 16, 128>}, {transform_indices = @transform_1, window_bounds = array<i64: 128, 512>}, {transform_indices = @transform_2, window_bounds = array<i64: 1, 512>}, {transform_indices = @transform_3, window_bounds = array<i64: 512, 128>}, {transform_indices = @transform_4, window_bounds = array<i64: 16, 128>}]} {
    %c0_i32 = arith.constant 0 : i32
    %0 = arith.cmpi eq, %arg1, %c0_i32 : i32
    %1 = arith.extui %0 : i1 to i32
    %c0_i32_0 = arith.constant 0 : i32
    %2 = arith.cmpi ne, %1, %c0_i32_0 : i32
    scf.if %2 {
      %c0_19 = arith.constant 0 : index
      %c0_20 = arith.constant 0 : index
      %32 = vector.load %arg2[%c0_19, %c0_20] : memref<16x128xf32, #tpu.memory_space<vmem>>, vector<16x128xf32>
      %cst_21 = arith.constant dense<0.000000e+00> : vector<16xf32>
      %33 = vector.multi_reduction <add>, %32, %cst_21 [1] : vector<16x128xf32> to vector<16xf32>
      %34 = vector.shape_cast %33 : vector<16xf32> to vector<16x1xf32>
      %cst_22 = arith.constant 1.280000e+02 : f32
      %35 = vector.broadcast %cst_22 : f32 to vector<16x1xf32>
      %36 = arith.divf %34, %35 : vector<16x1xf32>
      %37 = vector.broadcast %36 : vector<16x1xf32> to vector<16x128xf32>
      %38 = arith.subf %32, %37 : vector<16x128xf32>
      %39 = arith.mulf %38, %38 : vector<16x128xf32>
      %cst_23 = arith.constant dense<0.000000e+00> : vector<16xf32>
      %40 = vector.multi_reduction <add>, %39, %cst_23 [1] : vector<16x128xf32> to vector<16xf32>
      %41 = vector.shape_cast %40 : vector<16xf32> to vector<16x1xf32>
      %cst_24 = arith.constant 1.280000e+02 : f32
      %42 = vector.broadcast %cst_24 : f32 to vector<16x1xf32>
      %43 = arith.divf %41, %42 : vector<16x1xf32>
      %cst_25 = arith.constant 9.99999974E-6 : f32
      %44 = vector.broadcast %cst_25 : f32 to vector<16x1xf32>
      %45 = arith.addf %43, %44 : vector<16x1xf32>
      %46 = math.rsqrt %45 : vector<16x1xf32>
      %47 = vector.broadcast %46 : vector<16x1xf32> to vector<16x128xf32>
      %48 = arith.mulf %38, %47 : vector<16x128xf32>
      %49 = arith.truncf %48 : vector<16x128xf32> to vector<16x128xbf16>
      %c0_26 = arith.constant 0 : index
      %c0_27 = arith.constant 0 : index
      %50 = vector.load %arg7[%c0_26, %c0_27] : memref<16x128xbf16, #tpu.memory_space<vmem>>, vector<16x128xbf16>
      tpu.vector_store %arg7[%c0_26, %c0_27], %49 {strides = array<i32>} : memref<16x128xbf16, #tpu.memory_space<vmem>>, vector<16x128xbf16>,
      %cst_28 = arith.constant 0.000000e+00 : f32
      %51 = vector.broadcast %cst_28 : f32 to vector<16x128xf32>
      %c0_29 = arith.constant 0 : index
      %c0_30 = arith.constant 0 : index
      %52 = vector.load %arg8[%c0_29, %c0_30] : memref<16x128xf32, #tpu.memory_space<vmem>>, vector<16x128xf32>
      tpu.vector_store %arg8[%c0_29, %c0_30], %51 {strides = array<i32>} : memref<16x128xf32, #tpu.memory_space<vmem>>, vector<16x128xf32>,
    } else {
    }
    %c0 = arith.constant 0 : index
    %c0_1 = arith.constant 0 : index
    %3 = vector.load %arg7[%c0, %c0_1] : memref<16x128xbf16, #tpu.memory_space<vmem>>, vector<16x128xbf16>
    %c0_2 = arith.constant 0 : index
    %c0_3 = arith.constant 0 : index
    %4 = vector.load %arg3[%c0_2, %c0_3] : memref<128x512xbf16, #tpu.memory_space<vmem>>, vector<128x512xbf16>
    %cst = arith.constant dense<0.000000e+00> : vector<16x512xf32>
    %5 = tpu.matmul %3, %4, %cst {dimension_numbers = #tpu.dot_dimension_numbers<[1], [0], [0], [1], [0, 0, 1, 1], [], []>} : vector<16x128xbf16>, vector<128x512xbf16>, vector<16x512xf32> -> vector<16x512xf32>
    %c0_4 = arith.constant 0 : index
    %c0_5 = arith.constant 0 : index
    %6 = vector.load %arg4[%c0_4, %c0_5] : memref<1x512xf32, #tpu.memory_space<vmem>>, vector<1x512xf32>
    %7 = vector.broadcast %6 : vector<1x512xf32> to vector<16x512xf32>
    %8 = arith.addf %5, %7 : vector<16x512xf32>
    %cst_6 = arith.constant 0.636619746 : f32
    %9 = math.sqrt %cst_6 : f32
    %cst_7 = arith.constant 5.000000e-01 : f32
    %10 = vector.broadcast %cst_7 : f32 to vector<16x512xf32>
    %11 = arith.mulf %10, %8 : vector<16x512xf32>
    %cst_8 = arith.constant 4.471500e-02 : f32
    %12 = vector.broadcast %cst_8 : f32 to vector<16x512xf32>
    %13 = arith.mulf %12, %8 : vector<16x512xf32>
    %14 = arith.mulf %13, %8 : vector<16x512xf32>
    %15 = arith.mulf %14, %8 : vector<16x512xf32>
    %16 = arith.addf %8, %15 : vector<16x512xf32>
    %17 = vector.broadcast %9 : f32 to vector<16x512xf32>
    %18 = arith.mulf %17, %16 : vector<16x512xf32>
    %19 = math.tanh %18 : vector<16x512xf32>
    %cst_9 = arith.constant 1.000000e+00 : f32
    %20 = vector.broadcast %cst_9 : f32 to vector<16x512xf32>
    %21 = arith.addf %20, %19 : vector<16x512xf32>
    %22 = arith.mulf %11, %21 : vector<16x512xf32>
    %c0_10 = arith.constant 0 : index
    %c0_11 = arith.constant 0 : index
    %23 = vector.load %arg8[%c0_10, %c0_11] : memref<16x128xf32, #tpu.memory_space<vmem>>, vector<16x128xf32>
    %24 = arith.truncf %22 : vector<16x512xf32> to vector<16x512xbf16>
    %c0_12 = arith.constant 0 : index
    %c0_13 = arith.constant 0 : index
    %25 = vector.load %arg5[%c0_12, %c0_13] : memref<512x128xbf16, #tpu.memory_space<vmem>>, vector<512x128xbf16>
    %cst_14 = arith.constant dense<0.000000e+00> : vector<16x128xf32>
    %26 = tpu.matmul %24, %25, %cst_14 {dimension_numbers = #tpu.dot_dimension_numbers<[1], [0], [0], [1], [0, 0, 1, 1], [], []>} : vector<16x512xbf16>, vector<512x128xbf16>, vector<16x128xf32> -> vector<16x128xf32>
    %27 = arith.addf %23, %26 : vector<16x128xf32>
    %c0_15 = arith.constant 0 : index
    %c0_16 = arith.constant 0 : index
    %28 = vector.load %arg8[%c0_15, %c0_16] : memref<16x128xf32, #tpu.memory_space<vmem>>, vector<16x128xf32>
    tpu.vector_store %arg8[%c0_15, %c0_16], %27 {strides = array<i32>} : memref<16x128xf32, #tpu.memory_space<vmem>>, vector<16x128xf32>,
    %c0_i32_17 = arith.constant 0 : i32
    %29 = arith.cmpi eq, %arg1, %c0_i32_17 : i32
    %30 = arith.extui %29 : i1 to i32
    %c0_i32_18 = arith.constant 0 : i32
    %31 = arith.cmpi ne, %30, %c0_i32_18 : i32
    scf.if %31 {
      %c0_19 = arith.constant 0 : index
      %c0_20 = arith.constant 0 : index
      %32 = vector.load %arg8[%c0_19, %c0_20] : memref<16x128xf32, #tpu.memory_space<vmem>>, vector<16x128xf32>
      %c0_21 = arith.constant 0 : index
      %c0_22 = arith.constant 0 : index
      %33 = vector.load %arg6[%c0_21, %c0_22] : memref<16x128xf32, #tpu.memory_space<vmem>>, vector<16x128xf32>
      tpu.vector_store %arg6[%c0_21, %c0_22], %32 {strides = array<i32>} : memref<16x128xf32, #tpu.memory_space<vmem>>, vector<16x128xf32>,
    } else {
    }
    return
  }
  func.func @transform_0(%arg0: i32, %arg1: i32) -> (i32, i32) {
    %c0_i32 = arith.constant 0 : i32
    %c0_i32_0 = arith.constant 0 : i32
    return %arg0, %c0_i32 : i32, i32
  }
  func.func @transform_1(%arg0: i32, %arg1: i32) -> (i32, i32) {
    %c0_i32 = arith.constant 0 : i32
    %c0_i32_0 = arith.constant 0 : i32
    return %c0_i32, %arg1 : i32, i32
  }
  func.func @transform_2(%arg0: i32, %arg1: i32) -> (i32, i32) {
    %c0_i32 = arith.constant 0 : i32
    %c0_i32_0 = arith.constant 0 : i32
    return %c0_i32, %arg1 : i32, i32
  }
  func.func @transform_3(%arg0: i32, %arg1: i32) -> (i32, i32) {
    %c0_i32 = arith.constant 0 : i32
    %c0_i32_0 = arith.constant 0 : i32
    return %arg1, %c0_i32 : i32, i32
  }
  func.func @transform_4(%arg0: i32, %arg1: i32) -> (i32, i32) {
    %c0_i32 = arith.constant 0 : i32
    %c0_i32_0 = arith.constant 0 : i32
    return %arg0, %c0_i32 : i32, i32
  }
}

</mosaic_0001>

<bundles_post_ra>
// kernel: tpu_custom_call.1
= control target key start
LH: loop header
LB: loop body
LE: loop exit
PB: predicated region body
PF: predicated region fallthrough
CT: control target
= control target key end

     0   :  { %9 = vsyncpa [#allocation5], 0  ;;  %s1426_s0 = inlined_call_operand.hbm [shape: f32[16,128], index: 0, kind: input, shape index: {}]   ;;  %s1427_s1 = inlined_call_operand.hbm [shape: bf16[128,512], index: 1, kind: input, shape index: {}]   ;;  %s1428_s2 = inlined_call_operand.hbm [shape: f32[1,512], index: 2, kind: input, shape index: {}]   ;;  %s1429_s3 = inlined_call_operand.hbm [shape: bf16[512,128], index: 3, kind: input, shape index: {}]   ;;  %s1430_s4 = inlined_call_operand.hbm [shape: f32[16,128], index: 4, kind: output, shape index: {}]  }
   0x1   :  { %10 = vsyncpa [#allocation8], 0 }
   0x2   :  { %11 = vsyncpa [#allocation11], 0  ;;  %s30_s17 = sshll.u32 %s1427_s1, 4  ;;  %s31_s17 = int_to_ptr.hbm [resolvable:$true] %s30_s17 }
   0x3   :  { %12 = vsyncpa [#allocation6], 0  ;;  %s1318_s18 = smov [#allocation7]   ;;  %s17_s22 = sshll.u32 %s1426_s0, 4  ;;  %s18_s22 = int_to_ptr.hbm [resolvable:$true] %s17_s22 }
   0x4   :  { %s32_s19 = sshll.u32 %s1318_s18, 4  ;;  %s1319_s23 = smov 256   ;;  %s33_s19 = int_to_ptr.vmem [resolvable:$true] %s32_s19 }
   0x5   :  { %s1320_s24 = smov 16   ;;  %s1321_s25 = smov [#allocation4]  }
   0x6   :  { %38 = dma.hbm_to_vmem [thread:$0]  %s31_s17, 4096, %s33_s19, [#allocation8], %s1319_s23, %s1319_s23, %s1320_s24  }
   0x7   :  { %s19_s26 = sshll.u32 %s1321_s25, 4  ;;  %s1322_s27 = smov 128   ;;  %s20_s26 = int_to_ptr.vmem [resolvable:$true] %s19_s26 }
   0x8   :  { %s1323_s28 = smov 8   ;;  %s44_s30 = sshll.u32 %s1428_s2, 4  ;;  %s45_s30 = int_to_ptr.hbm [resolvable:$true] %s44_s30 }
   0x9   :  { %25 = dma.hbm_to_vmem [thread:$0]  %s18_s22, 256, %s20_s26, [#allocation5], %s1322_s27, %s1322_s27, %s1323_s28  }
   0xa   :  { %s1324_s5 = smov [#allocation9]   ;;  %s54_s8 = sshll.u32 %s1429_s3, 4  ;;  %s55_s8 = int_to_ptr.hbm [resolvable:$true] %s54_s8 }
   0xb   :  { %s46_s0 = sshll.u32 %s1324_s5, 4  ;;  %s1325_s9 = smov [#allocation10]   ;;  %s47_s0 = int_to_ptr.vmem [resolvable:$true] %s46_s0 }
   0xc   :  { %49 = dma.hbm_to_vmem [thread:$0]  %s45_s30, 64, %s47_s0, [#allocation8]  }
   0xd   :  { %s56_s10 = sshll.u32 %s1325_s9, 4  ;;  %s1326_s11 = smov 64   ;;  %s57_s10 = int_to_ptr.vmem [resolvable:$true] %s56_s10 }
   0xe   :  { %s1327_s12 = smov 4  }
   0xf   :  { %62 = dma.hbm_to_vmem [thread:$0]  %s55_s8, 4096, %s57_s10, [#allocation11], %s1326_s11, %s1326_s11, %s1327_s12  }
  0x10   :  { %1310 = dma.done.wait [#allocation5], 256  }
  0x11   :  { %1311 = vsyncadd [#allocation5], 4294967040 }
  0x12   :  { %1312 = dma.done.wait [#allocation8], 4160  }
  0x13   :  { %1313 = vsyncadd [#allocation8], 4294963136 }
  0x14   :  { %1314 = dma.done.wait [#allocation11], 4096  }
  0x15   :  { %1315 = vsyncadd [#allocation11], 4294963200  ;;  %v83_v0 = vld [vmem:[#allocation4] sm:$0xff]  ;;  %v84_v1 = vld [vmem:[#allocation4 + $0x8] sm:$0xff]  ;;  %v1328_v2 = vmov 128.0   ;;  %s1329_s2 = smov [#allocation12]  }
  0x16   :  { %85 = vadd.xlane.f32.xlu0 %v83_v0  ;;  %1168 = vrcp.f32 %v1328_v2  ;;  %v944_v17 = vld [vmem:[#allocation7 + $0xe0] sm:$0xf]  ;;  %v1117_v18 = vld [vmem:[#allocation7 + $0xec] sm:$0xf0]  ;;  %v1115_v19 = vld [vmem:[#allocation7 + $0xe4] sm:$0xf] }
  0x17   :  { %v945_v20 = vor.u32 %v1117_v18, %v944_v17  ;;  %v946_v21 = vld [vmem:[#allocation7 + $0xf0] sm:$0xf0]  ;;  %v952_v22 = vld [vmem:[#allocation7 + $0xe8] sm:$0xf]  ;;  %v1118_v23 = vld [vmem:[#allocation7 + $0xf4] sm:$0xf0] }
  0x18   :  { %v949_v24 = vor.u32 %v1115_v19, %v946_v21  ;;  %v953_v25 = vor.u32 %v1118_v23, %v952_v22  ;;  %v1116_v26 = vld [vmem:[#allocation7 + $0xec] sm:$0xf]  ;;  %v954_v27 = vld [vmem:[#allocation7 + $0xf8] sm:$0xf0]  ;;  %v928_v29 = vld [vmem:[#allocation7 + $0xc0] sm:$0xf] }
  0x19   :  { %348 = vmatpush.bf16.msra.mxu0 %v945_v20  ;;  %v957_v28 = vor.u32 %v1116_v26, %v954_v27  ;;  %v1113_v30 = vld [vmem:[#allocation7 + $0xcc] sm:$0xf0]  ;;  %v1111_v31 = vld [vmem:[#allocation7 + $0xc4] sm:$0xf]  ;;  %v930_v33 = vld [vmem:[#allocation7 + $0xd0] sm:$0xf0] }
  0x1a   :  { %362 = vmatpush.bf16.msra.mxu1 %v949_v24  ;;  %376 = vmatpush.bf16.msra.mxu2 %v953_v25  ;;  %v929_v32 = vor.u32 %v1113_v30, %v928_v29  ;;  %v936_v34 = vld [vmem:[#allocation7 + $0xc8] sm:$0xf]  ;;  %v1114_v35 = vld [vmem:[#allocation7 + $0xd4] sm:$0xf0]  ;;  %v933_v36 = vor.u32 %v1111_v31, %v930_v33  ;;  %v1112_v38 = vld [vmem:[#allocation7 + $0xcc] sm:$0xf] }
  0x1b   :  { %390 = vmatpush.bf16.msra.mxu3 %v957_v28  ;;  %v937_v37 = vor.u32 %v1114_v35, %v936_v34  ;;  %v938_v39 = vld [vmem:[#allocation7 + $0xd8] sm:$0xf0]  ;;  %v912_v41 = vld [vmem:[#allocation7 + $0xa0] sm:$0xf]  ;;  %v1109_v42 = vld [vmem:[#allocation7 + $0xac] sm:$0xf0] }
  0x1c   :  { %v1169_v3 = vpop.eup %1168  ;;  %v941_v40 = vor.u32 %v1112_v38, %v938_v39  ;;  %v1107_v43 = vld [vmem:[#allocation7 + $0xa4] sm:$0xf]  ;;  %v913_v44 = vor.u32 %v1109_v42, %v912_v41  ;;  %v914_v45 = vld [vmem:[#allocation7 + $0xb0] sm:$0xf0]  ;;  %v920_v46 = vld [vmem:[#allocation7 + $0xa8] sm:$0xf] }
  0x1d   :  { %v90_v4 = vmul.f32 128.0, %v1169_v3  ;;  %vm94_vm0 = vweird.f32 %v1169_v3  ;;  %349 = vmatpush.bf16.msra.mxu0 %v929_v32  ;;  %v1110_v47 = vld [vmem:[#allocation7 + $0xb4] sm:$0xf0]  ;;  %v917_v48 = vor.u32 %v1107_v43, %v914_v45  ;;  %v1108_v50 = vld [vmem:[#allocation7 + $0xac] sm:$0xf]  ;;  %s809_s3 = sshll.u32 %s1329_s2, 4  ;;  %s810_s3 = int_to_ptr.vmem [resolvable:$true] %s809_s3 }
  0x1e   :  { %87 = vadd.xlane.f32.xlu0 %v84_v1  ;;  %363 = vmatpush.bf16.msra.mxu1 %v933_v36  ;;  %v921_v49 = vor.u32 %v1110_v47, %v920_v46  ;;  %v922_v51 = vld [vmem:[#allocation7 + $0xb8] sm:$0xf0]  ;;  %v896_v53 = vld [vmem:[#allocation7 + $0x80] sm:$0xf]  ;;  %v1105_v54 = vld [vmem:[#allocation7 + $0x8c] sm:$0xf0] }
  0x1f   :  { %v91_v5 = vsub.f32 1.0, %v90_v4  ;;  %377 = vmatpush.bf16.msra.mxu2 %v937_v37  ;;  %391 = vmatpush.bf16.msra.mxu3 %v941_v40  ;;  %v925_v52 = vor.u32 %v1108_v50, %v922_v51  ;;  %v1103_v55 = vld [vmem:[#allocation7 + $0x84] sm:$0xf]  ;;  %v897_v56 = vor.u32 %v1105_v54, %v896_v53  ;;  %v898_v57 = vld [vmem:[#allocation7 + $0x90] sm:$0xf0]  ;;  %s811_s15 = sshll.u32 %s1430_s4, 4  ;;  %s812_s15 = int_to_ptr.hbm [resolvable:$true] %s811_s15 }
  0x20   :  { %v904_v58 = vld [vmem:[#allocation7 + $0x88] sm:$0xf]  ;;  %v1106_v59 = vld [vmem:[#allocation7 + $0x94] sm:$0xf0]  ;;  %v901_v60 = vor.u32 %v1103_v55, %v898_v57  ;;  %v1104_v62 = vld [vmem:[#allocation7 + $0x8c] sm:$0xf] }
  0x21   :  { %v92_v6 = vmul.f32 %v1169_v3, %v91_v5  ;;  %350 = vmatpush.bf16.msra.mxu0 %v913_v44  ;;  %v905_v61 = vor.u32 %v1106_v59, %v904_v58  ;;  %v906_v63 = vld [vmem:[#allocation7 + $0x98] sm:$0xf0]  ;;  %v1101_v2 = vld [vmem:[#allocation7 + $0x6c] sm:$0xf0]  ;;  %v882_v5 = vld [vmem:[#allocation7 + $0x70] sm:$0xf0] }
  0x22   :  { %364 = vmatpush.bf16.msra.mxu1 %v917_v48  ;;  %v1097_v17 = vld [vmem:[#allocation7 + $0x4c] sm:$0xf0]  ;;  %v1095_v18 = vld [vmem:[#allocation7 + $0x44] sm:$0xf]  ;;  %v866_v20 = vld [vmem:[#allocation7 + $0x50] sm:$0xf0] }
  0x23   :  { %v93_v7 = vadd.f32 %v1169_v3, %v92_v6  ;;  %378 = vmatpush.bf16.msra.mxu2 %v921_v49  ;;  %392 = vmatpush.bf16.msra.mxu3 %v925_v52  ;;  %v888_v6 = vld [vmem:[#allocation7 + $0x68] sm:$0xf]  ;;  %v1098_v22 = vld [vmem:[#allocation7 + $0x54] sm:$0xf0]  ;;  %v869_v24 = vor.u32 %v1095_v18, %v866_v20  ;;  %v1096_v26 = vld [vmem:[#allocation7 + $0x4c] sm:$0xf] }
  0x24   :  { %v872_v21 = vld [vmem:[#allocation7 + $0x48] sm:$0xf]  ;;  %v874_v27 = vld [vmem:[#allocation7 + $0x58] sm:$0xf0]  ;;  %v848_v30 = vld [vmem:[#allocation7 + $0x20] sm:$0xf] }
  0x25   :  { %v1370_v8 = vsel %vm94_vm0, %v1169_v3, %v93_v7  ;;  %351 = vmatpush.bf16.msra.mxu0 %v897_v56  ;;  %v1099_v3 = vld [vmem:[#allocation7 + $0x64] sm:$0xf]  ;;  %v1102_v7 = vld [vmem:[#allocation7 + $0x74] sm:$0xf0]  ;;  %v873_v25 = vor.u32 %v1098_v22, %v872_v21  ;;  %v877_v29 = vor.u32 %v1096_v26, %v874_v27  ;;  %v1093_v31 = vld [vmem:[#allocation7 + $0x2c] sm:$0xf0] }
  0x26   :  { %365 = vmatpush.bf16.msra.mxu1 %v901_v60  ;;  %v1091_v32 = vld [vmem:[#allocation7 + $0x24] sm:$0xf]  ;;  %v849_v34 = vor.u32 %v1093_v31, %v848_v30  ;;  %v850_v35 = vld [vmem:[#allocation7 + $0x30] sm:$0xf0]  ;;  %v856_v36 = vld [vmem:[#allocation7 + $0x28] sm:$0xf] }
  0x27   :  { %379 = vmatpush.bf16.msra.mxu2 %v905_v61  ;;  %v853_v37 = vor.u32 %v1091_v32, %v850_v35  ;;  %v1094_v38 = vld [vmem:[#allocation7 + $0x34] sm:$0xf0]  ;;  %v1092_v39 = vld [vmem:[#allocation7 + $0x2c] sm:$0xf]  ;;  %v858_v40 = vld [vmem:[#allocation7 + $0x38] sm:$0xf0] }
  0x28   :  { %v857_v41 = vor.u32 %v1094_v38, %v856_v36  ;;  %v861_v42 = vor.u32 %v1092_v39, %v858_v40  ;;  %v832_v43 = vld [vmem:[#allocation7] sm:$0xf]  ;;  %v1089_v44 = vld [vmem:[#allocation7 + $0xc] sm:$0xf0]  ;;  %v1087_v45 = vld [vmem:[#allocation7 + $0x4] sm:$0xf] }
  0x29   :  { %v833_v46 = vor.u32 %v1089_v44, %v832_v43  ;;  %v834_v47 = vld [vmem:[#allocation7 + $0x10] sm:$0xf0]  ;;  %v840_v48 = vld [vmem:[#allocation7 + $0x8] sm:$0xf]  ;;  %v1090_v49 = vld [vmem:[#allocation7 + $0x14] sm:$0xf0] }
  0x2a   :  { %v837_v50 = vor.u32 %v1087_v45, %v834_v47  ;;  %v841_v51 = vor.u32 %v1090_v49, %v840_v48  ;;  %v1088_v52 = vld [vmem:[#allocation7 + $0xc] sm:$0xf]  ;;  %v842_v53 = vld [vmem:[#allocation7 + $0x18] sm:$0xf0]  ;;  %v1141_v20 = vld [vmem:[#allocation10 + $0xb0] sm:$0xff] }
  0x2b   :  { %v845_v55 = vor.u32 %v1088_v52, %v842_v53  ;;  %v1142_v18 = vld [vmem:[#allocation10 + $0xb8] sm:$0xff]  ;;  %v1149_v21 = vld [vmem:[#allocation10 + $0xf0] sm:$0xff]  ;;  %v1123_v22 = vld [vmem:[#allocation10 + $0x20] sm:$0xff] }
  0x2c   :  { %v1122_v26 = vld [vmem:[#allocation10 + $0x18] sm:$0xff]  ;;  %v1121_v30 = vld [vmem:[#allocation10 + $0x10] sm:$0xff]  ;;  %v1128_v35 = vld [vmem:[#allocation10 + $0x48] sm:$0xff] }
  0x2d   :  { %v1130_v27 = vld [vmem:[#allocation10 + $0x58] sm:$0xff]  ;;  %v1129_v31 = vld [vmem:[#allocation10 + $0x50] sm:$0xff]  ;;  %v1119_v39 = vld [vmem:[#allocation10] sm:$0xff] }
  0x2e   :  { %v1138_v32 = vld [vmem:[#allocation10 + $0x98] sm:$0xff]  ;;  %v1145_v38 = vld [vmem:[#allocation10 + $0xd0] sm:$0xff]  ;;  %v1127_v40 = vld [vmem:[#allocation10 + $0x40] sm:$0xff] }
  0x2f   :  { %v1386_v36 = vld [vmem:[#allocation9] sm:$0xf]  ;;  %v1136_v43 = vld [vmem:[#allocation10 + $0x88] sm:$0xff]  ;;  %v1135_v53 = vld [vmem:[#allocation10 + $0x80] sm:$0xff] }
  0x30   :  { %v1144_v44 = vld [vmem:[#allocation10 + $0xc8] sm:$0xff]  ;;  %v177_v52 = vperm.slane %v1386_v36, 3 }
  0x89   :  { %v86_v9 = vpop.xlane.xlu0 %85 }
  0x8a   :  { %v96_v10 = vmul.f32 %v1370_v8, %v86_v9  ;;  %v885_v9 = vor.u32 %v1099_v3, %v882_v5 }
  0x8c   :  { %v1373_v11 = vsub.f32 %v83_v0, %v96_v10  ;;  %v909_v0 = vor.u32 %v1104_v62, %v906_v63  ;;  %v889_v10 = vor.u32 %v1102_v7, %v888_v6  ;;  %366 = vmatpush.bf16.msra.mxu1 %v885_v9 }
  0x8e   :  { %v100_v12 = vmul.f32 %v1373_v11, %v1373_v11  ;;  %393 = vmatpush.bf16.msra.mxu3 %v909_v0  ;;  %380 = vmatpush.bf16.msra.mxu2 %v889_v10 }
  0x90   :  { %102 = vadd.xlane.f32.xlu1 %v100_v12  ;;  %v1100_v12 = vld [vmem:[#allocation7 + $0x6c] sm:$0xf]  ;;  %367 = vmatpush.bf16.msra.mxu1 %v869_v24 }
  0x91   :  { %v88_v13 = vpop.xlane.xlu0 %87  ;;  %v1140_v24 = vld [vmem:[#allocation10 + $0xa8] sm:$0xff] }
  0x92   :  { %v97_v14 = vmul.f32 %v1370_v8, %v88_v13  ;;  %v890_v13 = vld [vmem:[#allocation7 + $0x78] sm:$0xf0]  ;;  %381 = vmatpush.bf16.msra.mxu2 %v873_v25  ;;  %v1148_v25 = vld [vmem:[#allocation10 + $0xe8] sm:$0xff] }
  0x94   :  { %v1378_v15 = vsub.f32 %v84_v1, %v97_v14  ;;  %v880_v1 = vld [vmem:[#allocation7 + $0x60] sm:$0xf]  ;;  %v893_v14 = vor.u32 %v1100_v12, %v890_v13  ;;  %368 = vmatpush.bf16.msra.mxu1 %v853_v37  ;;  %v1137_v37 = vld [vmem:[#allocation10 + $0x90] sm:$0xff] }
  0x95   :  { %v881_v4 = vor.u32 %v1101_v2, %v880_v1  ;;  %v1126_v13 = vld [vmem:[#allocation10 + $0x38] sm:$0xff] }
  0x96   :  { %v101_v16 = vmul.f32 %v1378_v15, %v1378_v15  ;;  %394 = vmatpush.bf16.msra.mxu3 %v893_v14  ;;  %382 = vmatpush.bf16.msra.mxu2 %v857_v41  ;;  %v1134_v14 = vld [vmem:[#allocation10 + $0x78] sm:$0xff]  ;;  %v174_v41 = vperm.slane %v1386_v36, 0 }
  0x97   :  { %352 = vmatpush.bf16.msra.mxu0 %v881_v4 }
  0x98   :  { %104 = vadd.xlane.f32.xlu1 %v101_v16  ;;  %v864_v16 = vld [vmem:[#allocation7 + $0x40] sm:$0xf]  ;;  %369 = vmatpush.bf16.msra.mxu1 %v837_v50 }
  0x99   :  { %v865_v19 = vor.u32 %v1097_v17, %v864_v16  ;;  %v1125_v16 = vld [vmem:[#allocation10 + $0x30] sm:$0xff] }
  0x9a   :  { %395 = vmatpush.bf16.msra.mxu3 %v877_v29  ;;  %383 = vmatpush.bf16.msra.mxu2 %v841_v51  ;;  %v1133_v17 = vld [vmem:[#allocation10 + $0x70] sm:$0xff]  ;;  %v1147_v29 = vld [vmem:[#allocation10 + $0xe0] sm:$0xff]  ;;  %v176_v51 = vperm.slane %v1386_v36, 2 }
  0x9b   :  { %353 = vmatpush.bf16.msra.mxu0 %v865_v19  ;;  %v1150_v19 = vld [vmem:[#allocation10 + $0xf8] sm:$0xff] }
  0x9c   :  { %752 = vmatpush.bf16.msrb.mxu1 %v1134_v14 }
  0x9e   :  { %396 = vmatpush.bf16.msra.mxu3 %v861_v42  ;;  %766 = vmatpush.bf16.msrb.mxu2 %v1142_v18  ;;  %v175_v42 = vperm.slane %v1386_v36, 1 }
  0x9f   :  { %354 = vmatpush.bf16.msra.mxu0 %v849_v34  ;;  %v1120_v34 = vld [vmem:[#allocation10 + $0x8] sm:$0xff] }
  0xa0   :  { %753 = vmatpush.bf16.msrb.mxu1 %v1133_v17 }
  0xa2   :  { %397 = vmatpush.bf16.msra.mxu3 %v845_v55  ;;  %767 = vmatpush.bf16.msrb.mxu2 %v1141_v20 }
  0xa3   :  { %355 = vmatpush.bf16.msra.mxu0 %v833_v46 }
  0xa6   :  { %780 = vmatpush.bf16.msrb.mxu3 %v1150_v19  ;;  %768 = vmatpush.bf16.msrb.mxu2 %v1140_v24 }
  0xa7   :  { %738 = vmatpush.bf16.msrb.mxu0 %v1126_v13 }
  0xaa   :  { %781 = vmatpush.bf16.msrb.mxu3 %v1149_v21 }
  0xab   :  { %739 = vmatpush.bf16.msrb.mxu0 %v1125_v16 }
  0xae   :  { %782 = vmatpush.bf16.msrb.mxu3 %v1148_v25 }
  0xb2   :  { %783 = vmatpush.bf16.msrb.mxu3 %v1147_v29 }
 0x103   :  { %v103_v23 = vpop.xlane.xlu1 %102 }
 0x104   :  { %v106_v28 = vmul.f32 %v103_v23, %v1370_v8  ;;  %v1131_v23 = vld [vmem:[#allocation10 + $0x60] sm:$0xff] }
 0x106   :  { %v108_v33 = vadd.f32 1e-05, %v106_v28  ;;  %v1139_v28 = vld [vmem:[#allocation10 + $0xa0] sm:$0xff] }
 0x107   :  { %769 = vmatpush.bf16.msrb.mxu2 %v1139_v28 }
 0x108   :  { %1170 = vrsqrt.f32 %v108_v33  ;;  %vm116_vm2 = vweird.f32 %v108_v33 }
 0x10b   :  { %v105_v54 = vpop.xlane.xlu1 %104  ;;  %770 = vmatpush.bf16.msrb.mxu2 %v1138_v32 }
 0x10c   :  { %v107_v56 = vmul.f32 %v105_v54, %v1370_v8  ;;  %v1143_v54 = vld [vmem:[#allocation10 + $0xc0] sm:$0xff] }
 0x10e   :  { %v1171_v57 = vpop.eup %1170  ;;  %v109_v58 = vadd.f32 1e-05, %v107_v56 }
 0x10f   :  { %v111_v59 = vmul.f32 %v1171_v57, %v108_v33  ;;  %vm117_vm1 = vweird.f32 %v1171_v57  ;;  %v1146_v33 = vld [vmem:[#allocation10 + $0xd8] sm:$0xff]  ;;  %771 = vmatpush.bf16.msrb.mxu2 %v1137_v37 }
 0x110   :  { %1172 = vrsqrt.f32 %v109_v58  ;;  %vm118_vm4 = vmor %vm116_vm2, %vm117_vm1  ;;  %vm126_vm5 = vweird.f32 %v109_v58  ;;  %784 = vmatpush.bf16.msrb.mxu3 %v1146_v33 }
 0x111   :  { %v112_v60 = vmul.f32 %v1171_v57, %v111_v59 }
 0x113   :  { %v113_v61 = vmul.f32 0.5, %v112_v60  ;;  %772 = vmatpush.bf16.msrb.mxu2 %v1136_v43 }
 0x114   :  { %785 = vmatpush.bf16.msrb.mxu3 %v1145_v38 }
 0x115   :  { %v114_v63 = vsub.f32 1.5, %v113_v61 }
 0x116   :  { %v1173_v62 = vpop.eup %1172 }
 0x117   :  { %v121_v0 = vmul.f32 %v1173_v62, %v109_v58  ;;  %v115_v2 = vmul.f32 %v1171_v57, %v114_v63  ;;  %vm127_vm3 = vweird.f32 %v1173_v62  ;;  %773 = vmatpush.bf16.msrb.mxu2 %v1135_v53 }
 0x118   :  { %vm128_vm6 = vmor %vm126_vm5, %vm127_vm3  ;;  %786 = vmatpush.bf16.msrb.mxu3 %v1144_v44 }
 0x119   :  { %v122_v1 = vmul.f32 %v1173_v62, %v121_v0  ;;  %v119_v8 = vsel %vm118_vm4, %v1171_v57, %v115_v2 }
 0x11a   :  { %v130_v7 = vmul.f32 %v119_v8, %v1373_v11  ;;  %v1124_v11 = vld [vmem:[#allocation10 + $0x28] sm:$0xff] }
 0x11b   :  { %v123_v3 = vmul.f32 0.5, %v122_v1  ;;  %740 = vmatpush.bf16.msrb.mxu0 %v1124_v11 }
 0x11c   :  { %787 = vmatpush.bf16.msrb.mxu3 %v1143_v54 }
 0x11d   :  { %v124_v4 = vsub.f32 1.5, %v123_v3 }
 0x11f   :  { %v125_v5 = vmul.f32 %v1173_v62, %v124_v4  ;;  %741 = vmatpush.bf16.msrb.mxu0 %v1123_v22 }
 0x121   :  { %v129_v6 = vsel %vm128_vm6, %v1173_v62, %v125_v5 }
 0x122   :  { %v131_v9 = vmul.f32 %v129_v6, %v1378_v15  ;;  %v1132_v15 = vld [vmem:[#allocation10 + $0x68] sm:$0xff] }
 0x123   :  { %754 = vmatpush.bf16.msrb.mxu1 %v1132_v15  ;;  %742 = vmatpush.bf16.msrb.mxu0 %v1122_v26 }
 0x124   :  { %v1154_v10 = vpack.c.bf16 %v131_v9, %v130_v7 }
 0x126   :  { %1155 = vst [vmem:[#allocation2] sm:$0xff] %v1154_v10  }
 0x127   :  { %755 = vmatpush.bf16.msrb.mxu1 %v1131_v23  ;;  %743 = vmatpush.bf16.msrb.mxu0 %v1121_v30 }
 0x12b   :  { %756 = vmatpush.bf16.msrb.mxu1 %v1130_v27  ;;  %744 = vmatpush.bf16.msrb.mxu0 %v1120_v34 }
 0x12d   :  { %v1086_v12 = vld [vmem:[#allocation2] sm:$0xff] }
 0x12e   :  { %356 = vmatmul.bf16.vlgmr.msra.gmra.mxu0 %v1086_v12  ;;  %370 = vmatmul.bf16.vlgmr.msra.gmra.mxu1 %v1086_v12 }
 0x12f   :  { %384 = vmatmul.bf16.vlgmr.msra.gmra.mxu2 %v1086_v12  ;;  %398 = vmatmul.bf16.vlgmr.msra.gmra.mxu3 %v1086_v12 }
 0x130   :  { %757 = vmatpush.bf16.msrb.mxu1 %v1129_v31  ;;  %745 = vmatpush.bf16.msrb.mxu0 %v1119_v39 }
 0x134   :  { %758 = vmatpush.bf16.msrb.mxu1 %v1128_v35 }
 0x138   :  { %759 = vmatpush.bf16.msrb.mxu1 %v1127_v40 }
 0x1ab   :  { %v357_v45 = vpop.f32.mrf.mxu0  ;;  %v371_v46 = vpop.f32.mrf.mxu1 }
 0x1ac   :  { %v1390_v47 = vadd.f32 %v357_v45, %v174_v41  ;;  %v1392_v48 = vadd.f32 %v371_v46, %v175_v42 }
 0x1ae   :  { %v412_v49 = vmul.f32 0.044715, %v1390_v47  ;;  %v413_v50 = vmul.f32 0.044715, %v1392_v48 }
 0x1b0   :  { %v420_v55 = vmul.f32 %v412_v49, %v1390_v47  ;;  %v421_v56 = vmul.f32 %v413_v50, %v1392_v48  ;;  %v404_v49 = vmul.f32 0.5, %v1390_v47 }
 0x1b2   :  { %v385_v57 = vpop.f32.mrf.mxu2  ;;  %v399_v58 = vpop.f32.mrf.mxu3  ;;  %v428_v59 = vmul.f32 %v420_v55, %v1390_v47  ;;  %v429_v60 = vmul.f32 %v421_v56, %v1392_v48 }
 0x1b3   :  { %v1402_v61 = vadd.f32 %v385_v57, %v176_v51  ;;  %v1404_v62 = vadd.f32 %v399_v58, %v177_v52  ;;  %v359_v63 = vpop.f32.mrf.mxu0  ;;  %v373_v0 = vpop.f32.mrf.mxu1 }
 0x1b4   :  { %v360_v1 = vadd.f32 %v359_v63, %v174_v41  ;;  %v374_v2 = vadd.f32 %v373_v0, %v175_v42  ;;  %v436_v3 = vadd.f32 %v428_v59, %v1390_v47  ;;  %v437_v5 = vadd.f32 %v429_v60, %v1392_v48 }
 0x1b5   :  { %v414_v4 = vmul.f32 0.044715, %v1402_v61  ;;  %v415_v8 = vmul.f32 0.044715, %v1404_v62 }
 0x1b6   :  { %v416_v6 = vmul.f32 0.044715, %v360_v1  ;;  %v417_v7 = vmul.f32 0.044715, %v374_v2  ;;  %v444_v14 = vmul.f32 0.7978845, %v436_v3 }
 0x1b7   :  { %v422_v9 = vmul.f32 %v414_v4, %v1402_v61  ;;  %v423_v10 = vmul.f32 %v415_v8, %v1404_v62  ;;  %v445_v16 = vmul.f32 0.7978845, %v437_v5  ;;  %v408_v50 = vmul.f32 0.5, %v360_v1 }
 0x1b8   :  { %v424_v12 = vmul.f32 %v416_v6, %v360_v1  ;;  %v425_v13 = vmul.f32 %v417_v7, %v374_v2  ;;  %1174 = vtanh.f32 %v444_v14  ;;  %v409_v53 = vmul.f32 0.5, %v374_v2 }
 0x1b9   :  { %v430_v17 = vmul.f32 %v422_v9, %v1402_v61  ;;  %v431_v18 = vmul.f32 %v423_v10, %v1404_v62  ;;  %1176 = vtanh.f32 %v445_v16  ;;  %v406_v8 = vmul.f32 0.5, %v1402_v61 }
 0x1ba   :  { %v387_v19 = vpop.f32.mrf.mxu2  ;;  %v401_v11 = vpop.f32.mrf.mxu3  ;;  %v432_v15 = vmul.f32 %v424_v12, %v360_v1  ;;  %v433_v20 = vmul.f32 %v425_v13, %v374_v2  ;;  %v407_v5 = vmul.f32 0.5, %v1404_v62 }
 0x1bb   :  { %v388_v21 = vadd.f32 %v387_v19, %v176_v51  ;;  %v402_v22 = vadd.f32 %v401_v11, %v177_v52  ;;  %v438_v23 = vadd.f32 %v430_v17, %v1402_v61  ;;  %v439_v26 = vadd.f32 %v431_v18, %v1404_v62 }
 0x1bc   :  { %v440_v24 = vadd.f32 %v432_v15, %v360_v1  ;;  %v441_v25 = vadd.f32 %v433_v20, %v374_v2  ;;  %v405_v52 = vmul.f32 0.5, %v1392_v48 }
 0x1bd   :  { %v418_v27 = vmul.f32 0.044715, %v388_v21  ;;  %v419_v28 = vmul.f32 0.044715, %v402_v22  ;;  %v446_v33 = vmul.f32 0.7978845, %v438_v23 }
 0x1be   :  { %v448_v29 = vmul.f32 0.7978845, %v440_v24  ;;  %v449_v30 = vmul.f32 0.7978845, %v441_v25  ;;  %v447_v34 = vmul.f32 0.7978845, %v439_v26  ;;  %v1175_v37 = vpop.eup %1174 }
 0x1bf   :  { %v426_v31 = vmul.f32 %v418_v27, %v388_v21  ;;  %v427_v32 = vmul.f32 %v419_v28, %v402_v22  ;;  %v1177_v38 = vpop.eup %1176  ;;  %v460_v41 = vadd.f32 1.0, %v1175_v37  ;;  %v410_v48 = vmul.f32 0.5, %v388_v21 }
 0x1c0   :  { %1178 = vtanh.f32 %v448_v29  ;;  %v461_v45 = vadd.f32 1.0, %v1177_v38  ;;  %v411_v6 = vmul.f32 0.5, %v402_v22 }
 0x1c1   :  { %1180 = vtanh.f32 %v449_v30  ;;  %v434_v35 = vmul.f32 %v426_v31, %v388_v21  ;;  %v435_v36 = vmul.f32 %v427_v32, %v402_v22  ;;  %v468_v56 = vmul.f32 %v460_v41, %v404_v49 }
 0x1c2   :  { %1182 = vtanh.f32 %v446_v33  ;;  %v469_v59 = vmul.f32 %v461_v45, %v405_v52 }
 0x1c3   :  { %v442_v39 = vadd.f32 %v434_v35, %v388_v21  ;;  %v443_v40 = vadd.f32 %v435_v36, %v402_v22  ;;  %1184 = vtanh.f32 %v447_v34 }
 0x1c5   :  { %v450_v42 = vmul.f32 0.7978845, %v442_v39  ;;  %v451_v43 = vmul.f32 0.7978845, %v443_v40 }
 0x1c6   :  { %v1179_v44 = vpop.eup %1178 }
 0x1c7   :  { %v1181_v46 = vpop.eup %1180  ;;  %v464_v51 = vadd.f32 1.0, %v1179_v44  ;;  %1186 = vtanh.f32 %v450_v42 }
 0x1c8   :  { %v465_v54 = vadd.f32 1.0, %v1181_v46  ;;  %1188 = vtanh.f32 %v451_v43  ;;  %v1183_v55 = vpop.eup %1182 }
 0x1c9   :  { %v472_v57 = vmul.f32 %v464_v51, %v408_v50  ;;  %v1185_v58 = vpop.eup %1184  ;;  %v462_v3 = vadd.f32 1.0, %v1183_v55 }
 0x1ca   :  { %v473_v60 = vmul.f32 %v465_v54, %v409_v53  ;;  %v463_v47 = vadd.f32 1.0, %v1185_v58 }
 0x1cb   :  { %v478_v63 = vpack.c.bf16 %v472_v57, %v468_v56  ;;  %v470_v9 = vmul.f32 %v462_v3, %v406_v8 }
 0x1cc   :  { %v479_v0 = vpack.c.bf16 %v473_v60, %v469_v59  ;;  %v471_v12 = vmul.f32 %v463_v47, %v407_v5 }
 0x1cd   :  { %v1187_v4 = vpop.eup %1186  ;;  %746 = vmatmul.bf16.vlgmr.msrb.gmra.mxu0 %v478_v63 }
 0x1ce   :  { %v1189_v1 = vpop.eup %1188  ;;  %760 = vmatmul.bf16.vlgmr.msrb.gmra.mxu1 %v479_v0  ;;  %v466_v2 = vadd.f32 1.0, %v1187_v4 }
 0x1cf   :  { %v467_v7 = vadd.f32 1.0, %v1189_v1 }
 0x1d0   :  { %v474_v10 = vmul.f32 %v466_v2, %v410_v48 }
 0x1d1   :  { %v475_v13 = vmul.f32 %v467_v7, %v411_v6 }
 0x1d2   :  { %v480_v14 = vpack.c.bf16 %v474_v10, %v470_v9 }
 0x1d3   :  { %v481_v16 = vpack.c.bf16 %v475_v13, %v471_v12 }
 0x1d4   :  { %774 = vmatmul.bf16.vlgmr.msrb.gmra.mxu2 %v480_v14 }
 0x1d5   :  { %788 = vmatmul.bf16.vlgmr.msrb.gmra.mxu3 %v481_v16 }
 0x24a   :  { %v747_v17 = vpop.f32.mrf.mxu0 }
 0x24b   :  { %v761_v18 = vpop.f32.mrf.mxu1 }
 0x24c   :  { %v762_v19 = vadd.f32 %v761_v18, %v747_v17 }
 0x252   :  { %v749_v21 = vpop.f32.mrf.mxu0 }
 0x253   :  { %v763_v23 = vpop.f32.mrf.mxu1 }
 0x254   :  { %v764_v62 = vadd.f32 %v763_v23, %v749_v21 }
 0x257   :  { %v775_v11 = vpop.f32.mrf.mxu2 }
 0x258   :  { %v776_v15 = vadd.f32 %v775_v11, %v762_v19  ;;  %v789_v61 = vpop.f32.mrf.mxu3 }
 0x25a   :  { %v790_v20 = vadd.f32 %v789_v61, %v776_v15 }
 0x25c   :  { %803 = vst [vmem:[#allocation12] sm:$0xff] %v790_v20 }
 0x25f   :  { %v777_v22 = vpop.f32.mrf.mxu2 }
 0x260   :  { %v778_v24 = vadd.f32 %v777_v22, %v764_v62  ;;  %v791_v25 = vpop.f32.mrf.mxu3 }
 0x262   :  { %v792_v26 = vadd.f32 %v791_v25, %v778_v24 }
 0x264   :  { %804 = vst [vmem:[#allocation12 + $0x8] sm:$0xff] %v792_v26 }
 0x265   :  { %817 = dma.vmem_to_hbm [thread:$0]  %s810_s3, 256, %s812_s15, [#allocation6], %s1322_s27, %s1322_s27, %s1323_s28  }
 0x266   :  { %1316 = dma.done.wait [#allocation6], 256  }
 0x267   :  { %1317 = vsyncadd [#allocation6], 4294967040 }
 0x268   :  { %822 = vsyncpa [#allocation5], 1 }
 0x269   :  { %823 = vsyncpa [#allocation8], 1 }
 0x26a   :  { %824 = vsyncpa [#allocation11], 1 }
 0x26b   :  { %825 = vsyncpa [#allocation6], 1 }

</bundles_post_ra>
